<compile_context>
chip_gen: v7x
topology: tpu7x:2x2x1
jax: 0.10.0
libtpu: 0.0.40
codegen_flags: <defaults>
</compile_context>

<pallas_src>
import functools

import jax
import jax.numpy as jnp
from jax.experimental import pallas as pl
from jax.experimental.pallas import tpu as pltpu


def _round_up(x, m):
    return ((x + m - 1) // m) * m


def _cdiv(a, b):
    return (a + b - 1) // b


def _sigmoid(z):
    # sigmoid(z) == 0.5 * tanh(0.5*z) + 0.5 — a single EUP op per gate.
    return 0.5 * jnp.tanh(0.5 * z) + 0.5


def _device_kind():
    try:
        if jax.default_backend() == "tpu":
            return jax.devices()[0].device_kind.lower()
    except Exception:
        pass
    return ""


def _vmem_cap_bytes():
    """Generation-aware VMEM budget: physical capacity minus ~8 MiB headroom."""
    if jax.default_backend() == "tpu":
        try:
            cap = getattr(pltpu.get_tpu_info(), "vmem_capacity_bytes", None)
            if cap:
                return max(int(cap) - 8 * 1024 * 1024, 16 * 1024 * 1024)
        except Exception:
            pass
    return 64 * 1024 * 1024


def lstm_recurrent_kernel(xw_ref, b_ref, wh_hbm_ref, h_out_ref, c_out_ref,
                          wh_vmem, h_sc, c_sc, dma_sem,
                          *, t_block, tail_steps, unroll, compute_dtype):
    """Recurrence only: gates[t] = xw[t] + b + h @ Wh (x @ Wx pre-hoisted).

    grid = (batch_blocks, time_blocks); time innermost ("arbitrary"), batch
    blocks independent ("parallel", used on 2-TC parts). h/c live in vregs
    inside the partially-unrolled loop; VMEM scratch only carries them across
    grid-step boundaries.
    """
    tb = pl.program_id(1)
    last_tb = pl.num_programs(1) - 1

    @pl.when(tb == 0)
    def _():
        # Single-buffered weight residency: Wh stays in HBM (pl.ANY) and is
        # DMA'd once into a persistent VMEM scratch.  The h/c zero-init is
        # overlapped with the in-flight DMA.
        cp = pltpu.make_async_copy(wh_hbm_ref, wh_vmem, dma_sem)
        cp.start()
        h_sc[...] = jnp.zeros_like(h_sc)
        c_sc[...] = jnp.zeros_like(c_sc)
        cp.wait()

    bias = b_ref[...].astype(jnp.float32)          # (1, 4Hp), broadcasts over rows
    hp = h_sc.shape[-1]

    def run_steps(n_steps):
        def step(i, carry):
            h, c = carry                           # f32 (nb, Hp), vreg-resident
            # Read Wh from VMEM inside the step (no loop-spanning live range).
            gates = (xw_ref[i].astype(jnp.float32) + bias
                     + jnp.dot(h.astype(compute_dtype), wh_vmem[...],
                               preferred_element_type=jnp.float32))
            i_t = _sigmoid(gates[:, 0 * hp:1 * hp])
            f_t = _sigmoid(gates[:, 1 * hp:2 * hp])
            g_t = jnp.tanh(gates[:, 2 * hp:3 * hp])
            o_t = _sigmoid(gates[:, 3 * hp:4 * hp])
            c_new = f_t * c + i_t * g_t
            h_new = o_t * jnp.tanh(c_new)
            return h_new, c_new

        h_f, c_f = jax.lax.fori_loop(0, n_steps, step, (h_sc[...], c_sc[...]),
                                     unroll=max(1, min(unroll, n_steps)))
        h_sc[...] = h_f
        c_sc[...] = c_f

    if tail_steps == t_block:
        # T divides evenly into time blocks: no masking / branching at all.
        run_steps(t_block)
    else:
        # Only the tail block (statically-known length) runs fewer steps;
        # full blocks stay completely mask-free.
        @pl.when(tb != last_tb)
        def _():
            run_steps(t_block)

        @pl.when(tb == last_tb)
        def _():
            run_steps(tail_steps)

    @pl.when(tb == last_tb)
    def _():
        h_out_ref[...] = h_sc[...].astype(h_out_ref.dtype)
        c_out_ref[...] = c_sc[...].astype(c_out_ref.dtype)


def lstm_forward(x, params, hidden_size, *, compute_dtype=None,
                 t_block=16, unroll=8):
    """x: (N, T, D) f32. params: dict with the 16 PyTorch LSTM parameters.
    Returns (h_T, c_T), each (N, hidden_size) f32."""
    N, T, D = x.shape
    assert T >= 1, "sequence length must be >= 1"
    H = hidden_size
    if compute_dtype is None:
        # bf16 only where the MXU consumes it; f32 fallback keeps the script
        # runnable on CPU / interpret backends (no bf16xbf16->f32 dot there).
        compute_dtype = (jnp.bfloat16 if jax.default_backend() == "tpu"
                         else jnp.float32)

    kind = _device_kind()
    two_tc = "v7" in kind                      # v7x: 2 TensorCores / chip
    nb_cap = 128 if "v5" in kind else 256      # MXU M tile per batch block

    Hp = _round_up(H, 128)                     # lane-aligned gates / outputs
    Np0 = _round_up(N, 8)
    # Split the batch only to (a) cap a block at the MXU M tile or (b) feed
    # both TensorCores on v7x; on single-TC parts extra blocks are pure
    # grid-step overhead (and a redundant Wh DMA).
    num_nb = max(_cdiv(Np0, nb_cap), 2 if (two_tc and Np0 > 8) else 1)
    nb = _round_up(_cdiv(N, num_nb), 8)
    Np = num_nb * nb

    t_block = max(1, min(t_block, T))
    Tp = _round_up(T, t_block)
    num_tb = Tp // t_block
    tail_steps = T - (num_tb - 1) * t_block    # in [1, t_block]

    def pad_cols(w):                           # (K, H) -> (K, Hp)
        return jnp.pad(w, ((0, 0), (0, Hp - H)))

    def pad_both(w):                           # (H, H) -> (Hp, Hp)
        return jnp.pad(w, ((0, Hp - H), (0, Hp - H)))

    def pad_vec(v):                            # (H,)   -> (Hp,)
        return jnp.pad(v, (0, Hp - H))

    # Gate order [i, f, g, o], each gate block padded to Hp columns.
    wx = jnp.concatenate([pad_cols(params["w_ii"]), pad_cols(params["w_if"]),
                          pad_cols(params["w_ig"]), pad_cols(params["w_io"])],
                         axis=1)                                     # (D, 4Hp)
    wh = jnp.concatenate([pad_both(params["w_hi"]), pad_both(params["w_hf"]),
                          pad_both(params["w_hg"]), pad_both(params["w_ho"])],
                         axis=1)                                     # (Hp, 4Hp)
    b = jnp.concatenate([pad_vec(params["b_ii"] + params["b_hi"]),
                         pad_vec(params["b_if"] + params["b_hf"]),
                         pad_vec(params["b_ig"] + params["b_hg"]),
                         pad_vec(params["b_io"] + params["b_ho"])]
                        ).reshape(1, 4 * Hp).astype(jnp.float32)     # (1, 4Hp)

    # Hoisted input projection (one big GEMM, M = Np*Tp).  x is transposed to
    # time-major FIRST (cheap: only D columns) so the einsum directly emits
    # (Tp, Np, 4Hp) — no post-GEMM transpose of the large intermediate.
    x_p = jnp.pad(x, ((0, Np - N), (0, Tp - T), (0, 0)))
    x_t = jnp.transpose(x_p, (1, 0, 2)).astype(compute_dtype)        # (Tp,Np,D)
    proj_precision = (jax.lax.Precision.HIGHEST
                      if compute_dtype == jnp.float32
                      else jax.lax.Precision.DEFAULT)
    xw = jnp.einsum("tnd,dg->tng", x_t, wx.astype(compute_dtype),
                    preferred_element_type=jnp.float32,
                    precision=proj_precision
                    ).astype(compute_dtype)                          # (Tp,Np,4Hp)
    wh_c = wh.astype(compute_dtype)

    kernel = functools.partial(lstm_recurrent_kernel, t_block=t_block,
                               tail_steps=tail_steps, unroll=unroll,
                               compute_dtype=compute_dtype)

    # VMEM budget: resident Wh + double-buffered xw blocks + bias + carries.
    # TODO(synk): for very large H (bf16 Wh >~ 24-32 MiB, i.e. H >~ 2048) tile
    # Wh over the 4Hp gate axis instead of keeping it fully resident (v7x).
    cd_bytes = jnp.dtype(compute_dtype).itemsize
    vmem_need = (Hp * 4 * Hp * cd_bytes                   # resident Wh
                 + 2 * t_block * nb * 4 * Hp * cd_bytes   # xw, double-buffered
                 + 4 * Hp * 4                             # bias
                 + 12 * nb * Hp * 4)                      # h/c carries + outs
    vmem_limit = int(min(max(2 * vmem_need, 32 * 1024 * 1024),
                         _vmem_cap_bytes()))

    h_pad, c_pad = pl.pallas_call(
        kernel,
        out_shape=(
            jax.ShapeDtypeStruct((Np, Hp), jnp.float32),
            jax.ShapeDtypeStruct((Np, Hp), jnp.float32),
        ),
        grid_spec=pltpu.PrefetchScalarGridSpec(
            num_scalar_prefetch=0,
            grid=(num_nb, num_tb),
            in_specs=[
                pl.BlockSpec((t_block, nb, 4 * Hp), lambda n, t: (t, n, 0)),
                pl.BlockSpec((1, 4 * Hp), lambda n, t: (0, 0)),
                pl.BlockSpec(memory_space=pl.ANY),      # Wh left in HBM
            ],
            out_specs=[
                pl.BlockSpec((nb, Hp), lambda n, t: (n, 0)),
                pl.BlockSpec((nb, Hp), lambda n, t: (n, 0)),
            ],
            scratch_shapes=[
                pltpu.VMEM((Hp, 4 * Hp), compute_dtype),   # resident Wh
                pltpu.VMEM((nb, Hp), jnp.float32),         # h carry
                pltpu.VMEM((nb, Hp), jnp.float32),         # c carry
                pltpu.SemaphoreType.DMA(()),
            ],
        ),
        compiler_params=pltpu.CompilerParams(
            dimension_semantics=("parallel", "arbitrary"),
            vmem_limit_bytes=vmem_limit),
    )(xw, b, wh_c)

    return h_pad[:N, :H], c_pad[:N, :H]


def xavier_uniform(key, shape):
    fan_in, fan_out = shape
    bound = jnp.sqrt(6.0 / (fan_in + fan_out))
    return jax.random.uniform(key, shape, jnp.float32, -bound, bound)


def make_params(key, input_size, hidden_size, *, bias_key=None, bias_scale=0.1):
    """Replicates LSTM.__init__ + init_hidden: xavier_uniform_ for 2-D params,
    zeros_ for 1-D. If bias_key is given, biases are small random values so the
    bias path in forward() is actually exercised."""
    names_x = ["w_ii", "w_if", "w_ig", "w_io"]
    names_h = ["w_hi", "w_hf", "w_hg", "w_ho"]
    keys = jax.random.split(key, 8)
    p = {}
    for i, n in enumerate(names_x):
        p[n] = xavier_uniform(keys[i], (input_size, hidden_size))
    for i, n in enumerate(names_h):
        p[n] = xavier_uniform(keys[4 + i], (hidden_size, hidden_size))
    bias_names = ["b_ii", "b_hi", "b_if", "b_hf", "b_ig", "b_hg", "b_io", "b_ho"]
    if bias_key is None:
        for n in bias_names:
            p[n] = jnp.zeros((hidden_size,), jnp.float32)
    else:
        bkeys = jax.random.split(bias_key, 8)
        for n, bk in zip(bias_names, bkeys):
            p[n] = bias_scale * jax.random.normal(bk, (hidden_size,), jnp.float32)
    return p


def lstm_reference(x, p, hidden_size):
    """Pure-JAX replica of the PyTorch forward (biases included)."""
    N, T, _ = x.shape
    hi = jax.lax.Precision.HIGHEST

    def mm(a, w):
        return jnp.dot(a, w, precision=hi)

    h = jnp.zeros((N, hidden_size), jnp.float32)
    c = jnp.zeros((N, hidden_size), jnp.float32)
    for t in range(T):
        xt = x[:, t, :]
        i = jax.nn.sigmoid(mm(xt, p["w_ii"]) + p["b_ii"] + mm(h, p["w_hi"]) + p["b_hi"])
        f = jax.nn.sigmoid(mm(xt, p["w_if"]) + p["b_if"] + mm(h, p["w_hf"]) + p["b_hf"])
        g = jnp.tanh(mm(xt, p["w_ig"]) + p["b_ig"] + mm(h, p["w_hg"]) + p["b_hg"])
        o = jax.nn.sigmoid(mm(xt, p["w_io"]) + p["b_io"] + mm(h, p["w_ho"]) + p["b_ho"])
        c = f * c + i * g
        h = o * jnp.tanh(c)
    return h, c


if __name__ == "__main__":
    key = jax.random.PRNGKey(0)
    k1, k2, k3, k4 = jax.random.split(key, 4)

    # Check 1: explicit f32 compute path, zero biases (as init_hidden leaves
    # them), T divisible by t_block -> exercises multi-grid-step carry and the
    # mask-free full-block loop.
    N, T, D, H = 2, 8, 4, 32
    x = jax.random.normal(k1, (N, T, D), jnp.float32)
    params = make_params(k2, D, H)
    h_k, c_k = lstm_forward(x, params, H, compute_dtype=jnp.float32, t_block=4)
    jax.block_until_ready((h_k, c_k))
    h_r, c_r = lstm_reference(x, params, H)
    # margin for MXU default-precision f32 matmul passes
    assert jnp.allclose(h_k, h_r, atol=2e-2, rtol=2e-2), "f32 h mismatch"
    assert jnp.allclose(c_k, c_r, atol=2e-2, rtol=2e-2), "f32 c mismatch"

    # Check 2: default compute path (bf16 on TPU, f32 fallback elsewhere),
    # NONZERO biases (validates the in-kernel bias add), ragged batch
    # (N=3 -> pad 8) and ragged T (10 with t_block=8 -> one full block + a
    # 2-step tail block) -> exercises both loop variants.
    N2, T2 = 3, 10
    x2 = jax.random.normal(k3, (N2, T2, D), jnp.float32)
    params2 = make_params(k2, D, H, bias_key=k4)
    h_k2, c_k2 = lstm_forward(x2, params2, H, t_block=8)
    jax.block_until_ready((h_k2, c_k2))
    h_r2, c_r2 = lstm_reference(x2, params2, H)
    # tolerance wide enough for bf16 rounding accumulated over T steps
    assert jnp.allclose(h_k2, h_r2, atol=1e-1, rtol=1e-1), "h mismatch"
    assert jnp.allclose(c_k2, c_r2, atol=1e-1, rtol=1e-1), "c mismatch"

    print("KERNEL_OK")
</pallas_src>

<mosaic_0001>
module attributes {stable_mosaic.version = 11 : i64} {
  func.func @lstm_recurrent_kernel(%arg0: i32, %arg1: i32, %arg2: memref<4x8x512xf32, #tpu.memory_space<vmem>>, %arg3: memref<1x512xf32, #tpu.memory_space<vmem>>, %arg4: memref<128x512xf32, #tpu.memory_space<any>>, %arg5: memref<8x128xf32, #tpu.memory_space<vmem>>, %arg6: memref<8x128xf32, #tpu.memory_space<vmem>>, %arg7: memref<128x512xf32, #tpu.memory_space<vmem>>, %arg8: memref<8x128xf32, #tpu.memory_space<vmem>>, %arg9: memref<8x128xf32, #tpu.memory_space<vmem>>, %arg10: memref<!tpu.dma_semaphore, #tpu.memory_space<semaphore_mem>>) attributes {dimension_semantics = [#tpu.dimension_semantics<parallel>, #tpu.dimension_semantics<arbitrary>], iteration_bounds = array<i64: 1, 2>, scalar_prefetch = 0 : i64, scratch_operands = 4 : i64, tpu.core_type = #tpu.core_type<tc>, window_params = [{transform_indices = @transform_0, window_bounds = array<i64: 4, 8, 512>}, {pipeline_mode = #tpu.pipeline_mode<synchronous>, transform_indices = @transform_1, window_bounds = array<i64: 1, 512>}, {}, {transform_indices = @transform_3, window_bounds = array<i64: 8, 128>}, {transform_indices = @transform_4, window_bounds = array<i64: 8, 128>}]} {
    %c0_i32 = arith.constant 0 : i32
    %0 = arith.cmpi eq, %arg1, %c0_i32 : i32
    %1 = arith.extui %0 : i1 to i32
    %c0_i32_0 = arith.constant 0 : i32
    %2 = arith.cmpi ne, %1, %c0_i32_0 : i32
    scf.if %2 {
      tpu.enqueue_dma source(%arg4 : memref<128x512xf32, #tpu.memory_space<any>>) target(%arg7 : memref<128x512xf32, #tpu.memory_space<vmem>>) target_semaphore(%arg10 : memref<!tpu.dma_semaphore, #tpu.memory_space<semaphore_mem>>)
      %cst_68 = arith.constant 0.000000e+00 : f32
      %167 = vector.broadcast %cst_68 : f32 to vector<8x128xf32>
      %c0_69 = arith.constant 0 : index
      %c0_70 = arith.constant 0 : index
      %168 = vector.load %arg8[%c0_69, %c0_70] : memref<8x128xf32, #tpu.memory_space<vmem>>, vector<8x128xf32>
      tpu.vector_store %arg8[%c0_69, %c0_70], %167 {strides = array<i32>} : memref<8x128xf32, #tpu.memory_space<vmem>>, vector<8x128xf32>,
      %cst_71 = arith.constant 0.000000e+00 : f32
      %169 = vector.broadcast %cst_71 : f32 to vector<8x128xf32>
      %c0_72 = arith.constant 0 : index
      %c0_73 = arith.constant 0 : index
      %170 = vector.load %arg9[%c0_72, %c0_73] : memref<8x128xf32, #tpu.memory_space<vmem>>, vector<8x128xf32>
      tpu.vector_store %arg9[%c0_72, %c0_73], %169 {strides = array<i32>} : memref<8x128xf32, #tpu.memory_space<vmem>>, vector<8x128xf32>,
      tpu.wait_dma2 semaphore(%arg10 : memref<!tpu.dma_semaphore, #tpu.memory_space<semaphore_mem>>) src(%arg4 : memref<128x512xf32, #tpu.memory_space<any>>) dst(%arg7 : memref<128x512xf32, #tpu.memory_space<vmem>>)
    } else {
    }
    %c0 = arith.constant 0 : index
    %c0_1 = arith.constant 0 : index
    %3 = vector.load %arg3[%c0, %c0_1] : memref<1x512xf32, #tpu.memory_space<vmem>>, vector<1x512xf32>
    %c0_2 = arith.constant 0 : index
    %c0_3 = arith.constant 0 : index
    %4 = vector.load %arg8[%c0_2, %c0_3] : memref<8x128xf32, #tpu.memory_space<vmem>>, vector<8x128xf32>
    %c0_4 = arith.constant 0 : index
    %c0_5 = arith.constant 0 : index
    %5 = vector.load %arg9[%c0_4, %c0_5] : memref<8x128xf32, #tpu.memory_space<vmem>>, vector<8x128xf32>
    %c0_i32_6 = arith.constant 0 : i32
    %6 = arith.index_cast %c0_i32_6 : i32 to index
    %c0_7 = arith.constant 0 : index
    %c0_8 = arith.constant 0 : index
    %7 = vector.load %arg2[%6, %c0_7, %c0_8] : memref<4x8x512xf32, #tpu.memory_space<vmem>>, vector<1x8x512xf32>
    %8 = vector.shape_cast %7 : vector<1x8x512xf32> to vector<8x512xf32>
    %9 = vector.broadcast %3 : vector<1x512xf32> to vector<8x512xf32>
    %10 = arith.addf %8, %9 : vector<8x512xf32>
    %c0_9 = arith.constant 0 : index
    %c0_10 = arith.constant 0 : index
    %11 = vector.load %arg7[%c0_9, %c0_10] : memref<128x512xf32, #tpu.memory_space<vmem>>, vector<128x512xf32>
    %cst = arith.constant dense<0.000000e+00> : vector<8x512xf32>
    %12 = tpu.matmul %4, %11, %cst {dimension_numbers = #tpu.dot_dimension_numbers<[1], [0], [0], [1], [0, 0, 1, 1], [], []>} : vector<8x128xf32>, vector<128x512xf32>, vector<8x512xf32> -> vector<8x512xf32>
    %13 = arith.addf %10, %12 : vector<8x512xf32>
    %14 = vector.extract_strided_slice %13 {offsets = [0, 0], sizes = [8, 128], strides = [1, 1]} : vector<8x512xf32> to vector<8x128xf32>
    %cst_11 = arith.constant 5.000000e-01 : f32
    %15 = vector.broadcast %cst_11 : f32 to vector<8x128xf32>
    %16 = arith.mulf %15, %14 : vector<8x128xf32>
    %17 = math.tanh %16 : vector<8x128xf32>
    %cst_12 = arith.constant 5.000000e-01 : f32
    %18 = vector.broadcast %cst_12 : f32 to vector<8x128xf32>
    %19 = arith.mulf %18, %17 : vector<8x128xf32>
    %cst_13 = arith.constant 5.000000e-01 : f32
    %20 = vector.broadcast %cst_13 : f32 to vector<8x128xf32>
    %21 = arith.addf %19, %20 : vector<8x128xf32>
    %22 = vector.extract_strided_slice %13 {offsets = [0, 128], sizes = [8, 128], strides = [1, 1]} : vector<8x512xf32> to vector<8x128xf32>
    %cst_14 = arith.constant 5.000000e-01 : f32
    %23 = vector.broadcast %cst_14 : f32 to vector<8x128xf32>
    %24 = arith.mulf %23, %22 : vector<8x128xf32>
    %25 = math.tanh %24 : vector<8x128xf32>
    %cst_15 = arith.constant 5.000000e-01 : f32
    %26 = vector.broadcast %cst_15 : f32 to vector<8x128xf32>
    %27 = arith.mulf %26, %25 : vector<8x128xf32>
    %cst_16 = arith.constant 5.000000e-01 : f32
    %28 = vector.broadcast %cst_16 : f32 to vector<8x128xf32>
    %29 = arith.addf %27, %28 : vector<8x128xf32>
    %30 = vector.extract_strided_slice %13 {offsets = [0, 256], sizes = [8, 128], strides = [1, 1]} : vector<8x512xf32> to vector<8x128xf32>
    %31 = math.tanh %30 : vector<8x128xf32>
    %32 = vector.extract_strided_slice %13 {offsets = [0, 384], sizes = [8, 128], strides = [1, 1]} : vector<8x512xf32> to vector<8x128xf32>
    %cst_17 = arith.constant 5.000000e-01 : f32
    %33 = vector.broadcast %cst_17 : f32 to vector<8x128xf32>
    %34 = arith.mulf %33, %32 : vector<8x128xf32>
    %35 = math.tanh %34 : vector<8x128xf32>
    %cst_18 = arith.constant 5.000000e-01 : f32
    %36 = vector.broadcast %cst_18 : f32 to vector<8x128xf32>
    %37 = arith.mulf %36, %35 : vector<8x128xf32>
    %cst_19 = arith.constant 5.000000e-01 : f32
    %38 = vector.broadcast %cst_19 : f32 to vector<8x128xf32>
    %39 = arith.addf %37, %38 : vector<8x128xf32>
    %40 = arith.mulf %29, %5 : vector<8x128xf32>
    %41 = arith.mulf %21, %31 : vector<8x128xf32>
    %42 = arith.addf %40, %41 : vector<8x128xf32>
    %43 = math.tanh %42 : vector<8x128xf32>
    %44 = arith.mulf %39, %43 : vector<8x128xf32>
    %c1_i32 = arith.constant 1 : i32
    %45 = arith.index_cast %c1_i32 : i32 to index
    %c0_20 = arith.constant 0 : index
    %c0_21 = arith.constant 0 : index
    %46 = vector.load %arg2[%45, %c0_20, %c0_21] : memref<4x8x512xf32, #tpu.memory_space<vmem>>, vector<1x8x512xf32>
    %47 = vector.shape_cast %46 : vector<1x8x512xf32> to vector<8x512xf32>
    %48 = vector.broadcast %3 : vector<1x512xf32> to vector<8x512xf32>
    %49 = arith.addf %47, %48 : vector<8x512xf32>
    %c0_22 = arith.constant 0 : index
    %c0_23 = arith.constant 0 : index
    %50 = vector.load %arg7[%c0_22, %c0_23] : memref<128x512xf32, #tpu.memory_space<vmem>>, vector<128x512xf32>
    %cst_24 = arith.constant dense<0.000000e+00> : vector<8x512xf32>
    %51 = tpu.matmul %44, %50, %cst_24 {dimension_numbers = #tpu.dot_dimension_numbers<[1], [0], [0], [1], [0, 0, 1, 1], [], []>} : vector<8x128xf32>, vector<128x512xf32>, vector<8x512xf32> -> vector<8x512xf32>
    %52 = arith.addf %49, %51 : vector<8x512xf32>
    %53 = vector.extract_strided_slice %52 {offsets = [0, 0], sizes = [8, 128], strides = [1, 1]} : vector<8x512xf32> to vector<8x128xf32>
    %cst_25 = arith.constant 5.000000e-01 : f32
    %54 = vector.broadcast %cst_25 : f32 to vector<8x128xf32>
    %55 = arith.mulf %54, %53 : vector<8x128xf32>
    %56 = math.tanh %55 : vector<8x128xf32>
    %cst_26 = arith.constant 5.000000e-01 : f32
    %57 = vector.broadcast %cst_26 : f32 to vector<8x128xf32>
    %58 = arith.mulf %57, %56 : vector<8x128xf32>
    %cst_27 = arith.constant 5.000000e-01 : f32
    %59 = vector.broadcast %cst_27 : f32 to vector<8x128xf32>
    %60 = arith.addf %58, %59 : vector<8x128xf32>
    %61 = vector.extract_strided_slice %52 {offsets = [0, 128], sizes = [8, 128], strides = [1, 1]} : vector<8x512xf32> to vector<8x128xf32>
    %cst_28 = arith.constant 5.000000e-01 : f32
    %62 = vector.broadcast %cst_28 : f32 to vector<8x128xf32>
    %63 = arith.mulf %62, %61 : vector<8x128xf32>
    %64 = math.tanh %63 : vector<8x128xf32>
    %cst_29 = arith.constant 5.000000e-01 : f32
    %65 = vector.broadcast %cst_29 : f32 to vector<8x128xf32>
    %66 = arith.mulf %65, %64 : vector<8x128xf32>
    %cst_30 = arith.constant 5.000000e-01 : f32
    %67 = vector.broadcast %cst_30 : f32 to vector<8x128xf32>
    %68 = arith.addf %66, %67 : vector<8x128xf32>
    %69 = vector.extract_strided_slice %52 {offsets = [0, 256], sizes = [8, 128], strides = [1, 1]} : vector<8x512xf32> to vector<8x128xf32>
    %70 = math.tanh %69 : vector<8x128xf32>
    %71 = vector.extract_strided_slice %52 {offsets = [0, 384], sizes = [8, 128], strides = [1, 1]} : vector<8x512xf32> to vector<8x128xf32>
    %cst_31 = arith.constant 5.000000e-01 : f32
    %72 = vector.broadcast %cst_31 : f32 to vector<8x128xf32>
    %73 = arith.mulf %72, %71 : vector<8x128xf32>
    %74 = math.tanh %73 : vector<8x128xf32>
    %cst_32 = arith.constant 5.000000e-01 : f32
    %75 = vector.broadcast %cst_32 : f32 to vector<8x128xf32>
    %76 = arith.mulf %75, %74 : vector<8x128xf32>
    %cst_33 = arith.constant 5.000000e-01 : f32
    %77 = vector.broadcast %cst_33 : f32 to vector<8x128xf32>
    %78 = arith.addf %76, %77 : vector<8x128xf32>
    %79 = arith.mulf %68, %42 : vector<8x128xf32>
    %80 = arith.mulf %60, %70 : vector<8x128xf32>
    %81 = arith.addf %79, %80 : vector<8x128xf32>
    %82 = math.tanh %81 : vector<8x128xf32>
    %83 = arith.mulf %78, %82 : vector<8x128xf32>
    %c2_i32 = arith.constant 2 : i32
    %84 = arith.index_cast %c2_i32 : i32 to index
    %c0_34 = arith.constant 0 : index
    %c0_35 = arith.constant 0 : index
    %85 = vector.load %arg2[%84, %c0_34, %c0_35] : memref<4x8x512xf32, #tpu.memory_space<vmem>>, vector<1x8x512xf32>
    %86 = vector.shape_cast %85 : vector<1x8x512xf32> to vector<8x512xf32>
    %87 = vector.broadcast %3 : vector<1x512xf32> to vector<8x512xf32>
    %88 = arith.addf %86, %87 : vector<8x512xf32>
    %c0_36 = arith.constant 0 : index
    %c0_37 = arith.constant 0 : index
    %89 = vector.load %arg7[%c0_36, %c0_37] : memref<128x512xf32, #tpu.memory_space<vmem>>, vector<128x512xf32>
    %cst_38 = arith.constant dense<0.000000e+00> : vector<8x512xf32>
    %90 = tpu.matmul %83, %89, %cst_38 {dimension_numbers = #tpu.dot_dimension_numbers<[1], [0], [0], [1], [0, 0, 1, 1], [], []>} : vector<8x128xf32>, vector<128x512xf32>, vector<8x512xf32> -> vector<8x512xf32>
    %91 = arith.addf %88, %90 : vector<8x512xf32>
    %92 = vector.extract_strided_slice %91 {offsets = [0, 0], sizes = [8, 128], strides = [1, 1]} : vector<8x512xf32> to vector<8x128xf32>
    %cst_39 = arith.constant 5.000000e-01 : f32
    %93 = vector.broadcast %cst_39 : f32 to vector<8x128xf32>
    %94 = arith.mulf %93, %92 : vector<8x128xf32>
    %95 = math.tanh %94 : vector<8x128xf32>
    %cst_40 = arith.constant 5.000000e-01 : f32
    %96 = vector.broadcast %cst_40 : f32 to vector<8x128xf32>
    %97 = arith.mulf %96, %95 : vector<8x128xf32>
    %cst_41 = arith.constant 5.000000e-01 : f32
    %98 = vector.broadcast %cst_41 : f32 to vector<8x128xf32>
    %99 = arith.addf %97, %98 : vector<8x128xf32>
    %100 = vector.extract_strided_slice %91 {offsets = [0, 128], sizes = [8, 128], strides = [1, 1]} : vector<8x512xf32> to vector<8x128xf32>
    %cst_42 = arith.constant 5.000000e-01 : f32
    %101 = vector.broadcast %cst_42 : f32 to vector<8x128xf32>
    %102 = arith.mulf %101, %100 : vector<8x128xf32>
    %103 = math.tanh %102 : vector<8x128xf32>
    %cst_43 = arith.constant 5.000000e-01 : f32
    %104 = vector.broadcast %cst_43 : f32 to vector<8x128xf32>
    %105 = arith.mulf %104, %103 : vector<8x128xf32>
    %cst_44 = arith.constant 5.000000e-01 : f32
    %106 = vector.broadcast %cst_44 : f32 to vector<8x128xf32>
    %107 = arith.addf %105, %106 : vector<8x128xf32>
    %108 = vector.extract_strided_slice %91 {offsets = [0, 256], sizes = [8, 128], strides = [1, 1]} : vector<8x512xf32> to vector<8x128xf32>
    %109 = math.tanh %108 : vector<8x128xf32>
    %110 = vector.extract_strided_slice %91 {offsets = [0, 384], sizes = [8, 128], strides = [1, 1]} : vector<8x512xf32> to vector<8x128xf32>
    %cst_45 = arith.constant 5.000000e-01 : f32
    %111 = vector.broadcast %cst_45 : f32 to vector<8x128xf32>
    %112 = arith.mulf %111, %110 : vector<8x128xf32>
    %113 = math.tanh %112 : vector<8x128xf32>
    %cst_46 = arith.constant 5.000000e-01 : f32
    %114 = vector.broadcast %cst_46 : f32 to vector<8x128xf32>
    %115 = arith.mulf %114, %113 : vector<8x128xf32>
    %cst_47 = arith.constant 5.000000e-01 : f32
    %116 = vector.broadcast %cst_47 : f32 to vector<8x128xf32>
    %117 = arith.addf %115, %116 : vector<8x128xf32>
    %118 = arith.mulf %107, %81 : vector<8x128xf32>
    %119 = arith.mulf %99, %109 : vector<8x128xf32>
    %120 = arith.addf %118, %119 : vector<8x128xf32>
    %121 = math.tanh %120 : vector<8x128xf32>
    %122 = arith.mulf %117, %121 : vector<8x128xf32>
    %c3_i32 = arith.constant 3 : i32
    %123 = arith.index_cast %c3_i32 : i32 to index
    %c0_48 = arith.constant 0 : index
    %c0_49 = arith.constant 0 : index
    %124 = vector.load %arg2[%123, %c0_48, %c0_49] : memref<4x8x512xf32, #tpu.memory_space<vmem>>, vector<1x8x512xf32>
    %125 = vector.shape_cast %124 : vector<1x8x512xf32> to vector<8x512xf32>
    %126 = vector.broadcast %3 : vector<1x512xf32> to vector<8x512xf32>
    %127 = arith.addf %125, %126 : vector<8x512xf32>
    %c0_50 = arith.constant 0 : index
    %c0_51 = arith.constant 0 : index
    %128 = vector.load %arg7[%c0_50, %c0_51] : memref<128x512xf32, #tpu.memory_space<vmem>>, vector<128x512xf32>
    %cst_52 = arith.constant dense<0.000000e+00> : vector<8x512xf32>
    %129 = tpu.matmul %122, %128, %cst_52 {dimension_numbers = #tpu.dot_dimension_numbers<[1], [0], [0], [1], [0, 0, 1, 1], [], []>} : vector<8x128xf32>, vector<128x512xf32>, vector<8x512xf32> -> vector<8x512xf32>
    %130 = arith.addf %127, %129 : vector<8x512xf32>
    %131 = vector.extract_strided_slice %130 {offsets = [0, 0], sizes = [8, 128], strides = [1, 1]} : vector<8x512xf32> to vector<8x128xf32>
    %cst_53 = arith.constant 5.000000e-01 : f32
    %132 = vector.broadcast %cst_53 : f32 to vector<8x128xf32>
    %133 = arith.mulf %132, %131 : vector<8x128xf32>
    %134 = math.tanh %133 : vector<8x128xf32>
    %cst_54 = arith.constant 5.000000e-01 : f32
    %135 = vector.broadcast %cst_54 : f32 to vector<8x128xf32>
    %136 = arith.mulf %135, %134 : vector<8x128xf32>
    %cst_55 = arith.constant 5.000000e-01 : f32
    %137 = vector.broadcast %cst_55 : f32 to vector<8x128xf32>
    %138 = arith.addf %136, %137 : vector<8x128xf32>
    %139 = vector.extract_strided_slice %130 {offsets = [0, 128], sizes = [8, 128], strides = [1, 1]} : vector<8x512xf32> to vector<8x128xf32>
    %cst_56 = arith.constant 5.000000e-01 : f32
    %140 = vector.broadcast %cst_56 : f32 to vector<8x128xf32>
    %141 = arith.mulf %140, %139 : vector<8x128xf32>
    %142 = math.tanh %141 : vector<8x128xf32>
    %cst_57 = arith.constant 5.000000e-01 : f32
    %143 = vector.broadcast %cst_57 : f32 to vector<8x128xf32>
    %144 = arith.mulf %143, %142 : vector<8x128xf32>
    %cst_58 = arith.constant 5.000000e-01 : f32
    %145 = vector.broadcast %cst_58 : f32 to vector<8x128xf32>
    %146 = arith.addf %144, %145 : vector<8x128xf32>
    %147 = vector.extract_strided_slice %130 {offsets = [0, 256], sizes = [8, 128], strides = [1, 1]} : vector<8x512xf32> to vector<8x128xf32>
    %148 = math.tanh %147 : vector<8x128xf32>
    %149 = vector.extract_strided_slice %130 {offsets = [0, 384], sizes = [8, 128], strides = [1, 1]} : vector<8x512xf32> to vector<8x128xf32>
    %cst_59 = arith.constant 5.000000e-01 : f32
    %150 = vector.broadcast %cst_59 : f32 to vector<8x128xf32>
    %151 = arith.mulf %150, %149 : vector<8x128xf32>
    %152 = math.tanh %151 : vector<8x128xf32>
    %cst_60 = arith.constant 5.000000e-01 : f32
    %153 = vector.broadcast %cst_60 : f32 to vector<8x128xf32>
    %154 = arith.mulf %153, %152 : vector<8x128xf32>
    %cst_61 = arith.constant 5.000000e-01 : f32
    %155 = vector.broadcast %cst_61 : f32 to vector<8x128xf32>
    %156 = arith.addf %154, %155 : vector<8x128xf32>
    %157 = arith.mulf %146, %120 : vector<8x128xf32>
    %158 = arith.mulf %138, %148 : vector<8x128xf32>
    %159 = arith.addf %157, %158 : vector<8x128xf32>
    %160 = math.tanh %159 : vector<8x128xf32>
    %161 = arith.mulf %156, %160 : vector<8x128xf32>
    %c4_i32 = arith.constant 4 : i32
    %c0_62 = arith.constant 0 : index
    %c0_63 = arith.constant 0 : index
    %162 = vector.load %arg8[%c0_62, %c0_63] : memref<8x128xf32, #tpu.memory_space<vmem>>, vector<8x128xf32>
    tpu.vector_store %arg8[%c0_62, %c0_63], %161 {strides = array<i32>} : memref<8x128xf32, #tpu.memory_space<vmem>>, vector<8x128xf32>,
    %c0_64 = arith.constant 0 : index
    %c0_65 = arith.constant 0 : index
    %163 = vector.load %arg9[%c0_64, %c0_65] : memref<8x128xf32, #tpu.memory_space<vmem>>, vector<8x128xf32>
    tpu.vector_store %arg9[%c0_64, %c0_65], %159 {strides = array<i32>} : memref<8x128xf32, #tpu.memory_space<vmem>>, vector<8x128xf32>,
    %c1_i32_66 = arith.constant 1 : i32
    %164 = arith.cmpi eq, %arg1, %c1_i32_66 : i32
    %165 = arith.extui %164 : i1 to i32
    %c0_i32_67 = arith.constant 0 : i32
    %166 = arith.cmpi ne, %165, %c0_i32_67 : i32
    scf.if %166 {
      %c0_68 = arith.constant 0 : index
      %c0_69 = arith.constant 0 : index
      %167 = vector.load %arg8[%c0_68, %c0_69] : memref<8x128xf32, #tpu.memory_space<vmem>>, vector<8x128xf32>
      %c0_70 = arith.constant 0 : index
      %c0_71 = arith.constant 0 : index
      %168 = vector.load %arg5[%c0_70, %c0_71] : memref<8x128xf32, #tpu.memory_space<vmem>>, vector<8x128xf32>
      tpu.vector_store %arg5[%c0_70, %c0_71], %167 {strides = array<i32>} : memref<8x128xf32, #tpu.memory_space<vmem>>, vector<8x128xf32>,
      %c0_72 = arith.constant 0 : index
      %c0_73 = arith.constant 0 : index
      %169 = vector.load %arg9[%c0_72, %c0_73] : memref<8x128xf32, #tpu.memory_space<vmem>>, vector<8x128xf32>
      %c0_74 = arith.constant 0 : index
      %c0_75 = arith.constant 0 : index
      %170 = vector.load %arg6[%c0_74, %c0_75] : memref<8x128xf32, #tpu.memory_space<vmem>>, vector<8x128xf32>
      tpu.vector_store %arg6[%c0_74, %c0_75], %169 {strides = array<i32>} : memref<8x128xf32, #tpu.memory_space<vmem>>, vector<8x128xf32>,
    } else {
    }
    return
  }
  func.func @transform_0(%arg0: i32, %arg1: i32) -> (i32, i32, i32) {
    %c0_i32 = arith.constant 0 : i32
    %c0_i32_0 = arith.constant 0 : i32
    return %arg1, %arg0, %c0_i32 : i32, i32, i32
  }
  func.func @transform_1(%arg0: i32, %arg1: i32) -> (i32, i32) {
    %c0_i32 = arith.constant 0 : i32
    %c0_i32_0 = arith.constant 0 : i32
    %c0_i32_1 = arith.constant 0 : i32
    return %c0_i32, %c0_i32_0 : i32, i32
  }
  func.func @transform_3(%arg0: i32, %arg1: i32) -> (i32, i32) {
    %c0_i32 = arith.constant 0 : i32
    %c0_i32_0 = arith.constant 0 : i32
    return %arg0, %c0_i32 : i32, i32
  }
  func.func @transform_4(%arg0: i32, %arg1: i32) -> (i32, i32) {
    %c0_i32 = arith.constant 0 : i32
    %c0_i32_0 = arith.constant 0 : i32
    return %arg0, %c0_i32 : i32, i32
  }
}

</mosaic_0001>

<bundles_post_ra>
// kernel: tpu_custom_call.1
= control target key start
LH: loop header
LB: loop body
LE: loop exit
PB: predicated region body
PF: predicated region fallthrough
CT: control target
= control target key end

     0   :  { %10 = vsyncpa [#allocation7], 0  ;;  %s2278_s0 = inlined_call_operand.hbm [shape: f32[8,8,512], index: 0, kind: input, shape index: {}]   ;;  %s2279_s1 = inlined_call_operand.hbm [shape: f32[1,512], index: 1, kind: input, shape index: {}]   ;;  %s2280_s2 = inlined_call_operand.hbm [shape: f32[128,512], index: 2, kind: input, shape index: {}]   ;;  %s2281_s3 = inlined_call_operand.hbm [shape: f32[8,128], index: 3, kind: output, shape index: {0}]   ;;  %s2282_s4 = inlined_call_operand.hbm [shape: f32[8,128], index: 4, kind: output, shape index: {1}]  }
   0x1   :  { %12 = vsyncpa [#allocation7 + $0x1], 0 }
   0x2   :  { %13 = vsyncpa [#allocation10], 0 }
   0x3   :  { %14 = vsyncpa [#allocation8], 0 }
   0x4   :  { %15 = vsyncpa [#allocation13], 0  ;;  %s1790_s15 = smov 0   ;;  %s1792_s16 = smov 0  }
   0x5   :  { %s1794_s17 = smov 0   ;;  %s1796_s18 = smov 0  }
   0x6   :  { %s1798_s19 = smov 0   ;;  %s1800_s20 = smov 0  }
   0x7 LB: > { %s1143_s21 = sadd.s32 4294967295, %s1754_s20   ;;  %s42_s22 = sadd.s32 1, %s1742_s17  ;;  %s1754_s20 = sphi %s1800_s20, %s21_s20   ;;  %s1750_s19 = sphi %s1798_s19, %s2304_s19   ;;  %s1746_s18 = sphi %s1796_s18, %s2303_s18   ;;  %s1742_s17 = sphi %s1794_s17, %s2302_s17   ;;  %s1738_s16 = sphi %s1792_s16, %s2301_s16   ;;  %s1734_s15 = sphi %s1790_s15, %s2300_s15  }
   0x8   : > { %p49_p0 = scmp.ne.s32.totalorder %s1742_s17, %s1738_s16  ;;  %p50_p1 = scmp.eq.s32.totalorder %s1754_s20, 0 }
   0x9   : > { %p55_p2 = scmp.ne.s32.totalorder %s1738_s16, %s1734_s15  ;;  %p1826_p3 = scmp.eq.s32.totalorder %s1143_s21, 0 }
   0xa   : > { %p51_p4 = por %p50_p1, %p49_p0  ;;  %p1144_p5 = scmp.ge.s32.totalorder %s1754_s20, 1 }
   0xb   : > { %s2288_s23 = scalar_select %p1826_p3, 1, 0 }
   0xc   : > { %p1833_p6 = por %p1826_p3, %p55_p2  ;;  %p139_p7 = scmp.lt.s32.totalorder %s1754_s20, 3 }
   0xd   : > { %s1756_s26 = smov [#allocation9]   ;;  %p1456_p10 = scmp.lt.s32.totalorder %s1754_s20, 2 }
   0xe   : > { %s2289_s24 = scalar_select %p1833_p6, 1, 0 }
   0xf   : > { %p1838_p8 = pnand %p1144_p5, %p139_p7  ;;  %s152_s27 = sshll.u32 %s1756_s26, 4  ;;  %s153_s27 = int_to_ptr.vmem [resolvable:$true] %s152_s27 }
  0x10   : > { %s163_s28 = sand.u32 1, %s1742_s17   ;;  %p1852_p12 = pnand %p1456_p10, %p51_p4 }
  0x11   : > { %s2290_s25 = scalar_select %p1838_p8, 1, 0 }
  0x12   : > { %p1447_p9 = pneg %p1838_p8  ;;  %s1558_s7 = scalar_lea.hbm %s2279_s1, 64 }
  0x13   : > { %s2292_s30 = scalar_select %p1852_p12, 1, 0 }
  0x14   : > { %p1848_p11 = pnand %p1447_p9, %p1826_p3  ;;  %p1559_p13 = scmp.ne.s32.totalorder %s2279_s1, %s1558_s7 }
  0x15   : > { %p1565_p5 = scmp.lt.u32.totalorder %s1558_s7, %s2279_s1 }
  0x16   : > { %p1560_p0 = pneg %p1848_p11 }
  0x18   : > { %p1561_p1 = pnand %p1560_p0, %p1559_p13 }
  0x1a   : > { %p1562_p2 = pneg %p1561_p1 }
  0x1c   : > { %p1567_p4 = pnand %p1565_p5, %p1562_p2 }
  0x1e   : > { %1570 = shalt.err (!%p1567_p4)
}
  0x1f   : > { %s1571_s12 = scalar_lea.vmem %s153_s27, 64  ;;  %p1579_p3 = scmp.lt.s32.totalorder %s153_s27, %s153_s27 }
  0x20   : > { %p1572_p7 = scmp.ne.s32.totalorder %s153_s27, %s1571_s12  ;;  %p1580_p6 = scmp.lt.s32.totalorder %s1571_s12, %s1571_s12 }
  0x22   : > { %p1574_p9 = pnand %p1572_p7, %p1560_p0  ;;  %p1581_p8 = por %p1580_p6, %p1579_p3 }
  0x24   : > { %p1575_p10 = pneg %p1574_p9 }
  0x26   : > { %p1582_p12 = pnand %p1581_p8, %p1575_p10 }
  0x28   : > { %1585 = shalt.err (!%p1582_p12)
}
  0x29   : > { %1450 = dma.hbm_to_vmem [thread:$0]  (!%p1848_p11), %s2279_s1, 64, %s153_s27, [#allocation10]  }
  0x2a   : > { %s30_s15 = sadd.s32 1, %s1750_s19  ;;  %s1147_s26 = sshll.u32 %s163_s28, 7 }
  0x2b   : > { %p31_p13 = scmp.ge.s32.totalorder %s30_s15, 2  ;;  %s1176_s5 = sshll.u32 %s1750_s19, 11 }
  0x2c   : > { %s167_s6 = scalar_lea.vmem [#allocation6], %s1147_s26  ;;  %s1881_s9 = scalar_lea.hbm %s2278_s0, %s1176_s5 }
  0x2d   : > { %s177_s7 = sshll.u32 %s167_s6, 4  ;;  %s2306_s15 = smov (%p31_p13, %s30_s15), 0  ;;  %s1883_s7 = int_to_ptr.vmem [resolvable:$true] %s177_s7 }
  0x2e   : > { %s37_s27 = ssub.s32 %s1750_s19, %s2306_s15  ;;  %s1893_s11 = scalar_lea.sflag [#allocation7], %s163_s28 }
  0x2f   : > { %p1887_p3 = scmp.eq.s32.totalorder %s37_s27, 0  ;;  %s1586_s12 = scalar_lea.hbm %s1881_s9, 2048 }
  0x30   : > { %p1587_p6 = scmp.ne.s32.totalorder %s1881_s9, %s1586_s12  ;;  %p2294_p8 = scmp.ne.s32.totalorder %s2292_s30, 0 }
  0x31   : > { %s1591_s26 = scalar_lea.hbm %s2278_s0, 4096  ;;  %p1592_p1 = scmp.lt.u32.totalorder %s1881_s9, %s2278_s0 }
  0x32   : > { %p1588_p11 = pneg %p2294_p8  ;;  %p1593_p2 = scmp.lt.u32.totalorder %s1591_s26, %s1586_s12 }
  0x33   : > { %p1595_p4 = scmp.lt.u32.totalorder %s1586_s12, %s1881_s9 }
  0x34   : > { %p1589_p12 = pnand %p1588_p11, %p1587_p6  ;;  %p1594_p5 = por %p1593_p2, %p1592_p1 }
  0x36   : > { %p1590_p0 = pneg %p1589_p12  ;;  %p1596_p7 = por %p1595_p4, %p1594_p5 }
  0x38   : > { %p1597_p9 = pnand %p1596_p7, %p1590_p0 }
  0x3a   : > { %1600 = shalt.err (!%p1597_p9)
}
  0x3b   : > { %s1601_s28 = scalar_lea.vmem %s1883_s7, 2048  ;;  %s1757_s29 = smov [#allocation6]  }
  0x3c   : > { %p1602_p10 = scmp.ne.s32.totalorder %s1883_s7, %s1601_s28  ;;  %s1606_s8 = sshll.u32 %s1757_s29, 4  ;;  %s1607_s8 = int_to_ptr.vmem [resolvable:$false] %s1606_s8 }
  0x3d   : > { %s1608_s27 = scalar_lea.vmem %s1607_s8, 4096  ;;  %p1609_p12 = scmp.lt.s32.totalorder %s1883_s7, %s1607_s8 }
  0x3e   : > { %p1604_p13 = pnand %p1602_p10, %p1588_p11  ;;  %p1610_p1 = scmp.lt.s32.totalorder %s1608_s27, %s1601_s28 }
  0x40   : > { %p1605_p6 = pneg %p1604_p13  ;;  %p1611_p2 = por %p1610_p1, %p1609_p12 }
  0x42   : > { %p1612_p5 = pnand %p1611_p2, %p1605_p6 }
  0x44   : > { %1615 = shalt.err (!%p1612_p5)
}
  0x45   : > { %s1758_s12 = smov 512   ;;  %s1759_s13 = smov 32  }
  0x46   : > { %1454 = dma.hbm_to_vmem [thread:$0]  (!%p2294_p8), %s1881_s9, 2048, %s1883_s7, %s1893_s11, %s1758_s12, %s1758_s12, %s1759_s13  }
  0x47   : > { %s1926_s14 = scalar_select %p1887_p3, %s1742_s17, %s42_s22  }
  0x48   : > { %p2295_p11 = scmp.ne.s32.totalorder %s2290_s25, 0 }
  0x49   : > { %s191_s26 = sand.u32 (!%p2295_p11), 1, %s1738_s16   ;;  %p2296_p0 = scmp.ne.s32.totalorder (!%p2295_p11), %s2289_s24, 0 }
  0x4a   : > { %189 = sbr.rel (%p2295_p11) target bundleno = 1195 (0x4ab), region = 28  ;;  %s1152_s5 = sshll.u32 (!%p2295_p11), %s191_s26, 7 }
  0x4b   : > { %s192_s6 = scalar_lea.sflag (!%p2295_p11), [#allocation7], %s191_s26  ;;  %s1931_s28 = scalar_lea.vmem (!%p2295_p11), [#allocation6], %s1152_s5 }
  0x51   : > { %1715 = dma.done.wait (%p2296_p0), %s192_s6, 2048  }
  0x52   : > { %1717 = vsyncadd (%p2296_p0), %s192_s6, 4294965248  ;;  %p2297_p8 = scmp.ne.s32.totalorder %s2288_s23, 0 }
  0x54   : > { %1719 = dma.done.wait (%p2297_p8), [#allocation10], 64  }
  0x55   : > { %1721 = vsyncadd (%p2297_p8), [#allocation10], 4294967232  ;;  %p1154_p3 = scmp.ne.s32.totalorder %s1746_s18, 0 }
  0x56   : > { %s1760_s22 = smov (!%p1154_p3), [#allocation2]   ;;  %v1761_v0 = vmov (!%p1154_p3), 0.0   ;;  %s1616_s24 = scalar_lea.hbm (!%p1154_p3), %s2280_s2, 8192 }
  0x57   : > { %221 = sbr.rel (%p1154_p3) target bundleno = 106 (0x6a), region = 40  ;;  %s229_s25 = sshll.u32 (!%p1154_p3), %s1760_s22, 4  ;;  %233 = vst [vmem:[#allocation3] sm:$0xff] (!%p1154_p3), %v1761_v0  ;;  %234 = vst [vmem:[#allocation4] sm:$0xff] (!%p1154_p3), %v1761_v0  ;;  %s230_s25 = int_to_ptr.vmem [resolvable:$true] %s229_s25 }
  0x58   : > { %p1617_p4 = scmp.ne.s32.totalorder (!%p1154_p3), %s2280_s2, %s1616_s24  ;;  %p1620_p7 = scmp.lt.u32.totalorder (!%p1154_p3), %s1616_s24, %s2280_s2 }
  0x5a   : > { %p1622_p9 = pnand (!%p1154_p3), %p1620_p7, %p1617_p4 }
  0x5e   : > { %1625 = shalt.err (!%p1622_p9)  }
  0x5f   : > { %s1626_s29 = scalar_lea.vmem %s230_s25, 8192  ;;  %p1631_p13 = scmp.lt.s32.totalorder %s230_s25, %s230_s25 }
  0x60   : > { %p1627_p10 = scmp.ne.s32.totalorder %s230_s25, %s1626_s29  ;;  %p1632_p6 = scmp.lt.s32.totalorder %s1626_s29, %s1626_s29 }
  0x62   : > { %p1633_p12 = por %p1632_p6, %p1631_p13 }
  0x64   : > { %p1634_p1 = pnand %p1633_p12, %p1627_p10 }
  0x66   : > { %1637 = shalt.err (!%p1634_p1)  }
  0x67   : > { %232 = dma.hbm_to_vmem [thread:$0]  %s2280_s2, 8192, %s230_s25, [#allocation5] }
  0x68   : > { %1722 = dma.done.wait [#allocation5], 8192 }
  0x69   : > { %1723 = vsyncadd [#allocation5], 4294959104 }
  0x6a PF: > { %v272_v1 = vld [vmem:[#allocation2 + $0x8] sm:$0xff]  ;;  %v271_v3 = vld [vmem:[#allocation2] sm:$0xff]  ;;  %v1762_v8 = vmov 0.0   ;;  %v274_v13 = vld [vmem:[#allocation2 + $0x18] sm:$0xff]  ;;  %p1167_p2 = scmp.ne.s32.totalorder %s1746_s18, 1 }
  0x6b   : > { %v276_v2 = vld [vmem:[#allocation2 + $0x28] sm:$0xff]  ;;  %v275_v5 = vld [vmem:[#allocation2 + $0x20] sm:$0xff]  ;;  %399 = vmatprep.mubr.f32.mxu0 %v1762_v8  ;;  %470 = vmatprep.mubr.f32.mxu1 %v1762_v8  ;;  %v278_v14 = vld [vmem:[#allocation2 + $0x38] sm:$0xff] }
  0x6c   : > { %v1954_v4 = vpack.c.bf16 %v276_v2, %v272_v1  ;;  %v280_v6 = vld [vmem:[#allocation2 + $0x48] sm:$0xff]  ;;  %v1958_v9 = vpack.c.bf16 %v275_v5, %v271_v3  ;;  %v279_v11 = vld [vmem:[#allocation2 + $0x40] sm:$0xff]  ;;  %v273_v15 = vld [vmem:[#allocation2 + $0x10] sm:$0xff]  ;;  %v1966_v18 = vpack.c.bf16 %v278_v14, %v274_v13 }
  0x6d   : > { %v284_v7 = vld [vmem:[#allocation2 + $0x68] sm:$0xff]  ;;  %v283_v12 = vld [vmem:[#allocation2 + $0x60] sm:$0xff]  ;;  %v277_v16 = vld [vmem:[#allocation2 + $0x30] sm:$0xff] }
  0x6e   : > { %v1960_v10 = vpack.c.bf16 %v284_v7, %v280_v6  ;;  %1178 = vmatprep.subr.bf16.mxu0 %v1954_v4  ;;  %v1964_v17 = vpack.c.bf16 %v283_v12, %v279_v11  ;;  %v1968_v19 = vpack.c.bf16 %v277_v16, %v273_v15  ;;  %v288_v20 = vld [vmem:[#allocation2 + $0x88] sm:$0xff]  ;;  %v287_v22 = vld [vmem:[#allocation2 + $0x80] sm:$0xff]  ;;  %v282_v25 = vld [vmem:[#allocation2 + $0x58] sm:$0xff]  ;;  %1210 = vmatprep.subr.bf16.mxu1 %v1966_v18 }
  0x6f   : > { %1180 = vmatpush1.bf16.msra.mxu0 %v1958_v9  ;;  %v292_v21 = vld [vmem:[#allocation2 + $0xa8] sm:$0xff]  ;;  %v291_v24 = vld [vmem:[#allocation2 + $0xa0] sm:$0xff]  ;;  %v286_v26 = vld [vmem:[#allocation2 + $0x78] sm:$0xff] }
  0x70   : > { %1182 = vmatprep.subr.bf16.mxu0 %v1960_v10  ;;  %v1971_v23 = vpack.c.bf16 %v292_v21, %v288_v20  ;;  %v1974_v27 = vpack.c.bf16 %v286_v26, %v282_v25  ;;  %v281_v28 = vld [vmem:[#allocation2 + $0x50] sm:$0xff]  ;;  %v296_v30 = vld [vmem:[#allocation2 + $0xc8] sm:$0xff]  ;;  %1212 = vmatpush1.bf16.msra.mxu1 %v1968_v19  ;;  %v1980_v33 = vpack.c.bf16 %v291_v24, %v287_v22  ;;  %v290_v34 = vld [vmem:[#allocation2 + $0x98] sm:$0xff] }
  0x71   : > { %v285_v29 = vld [vmem:[#allocation2 + $0x70] sm:$0xff]  ;;  %v300_v32 = vld [vmem:[#allocation2 + $0xe8] sm:$0xff]  ;;  %v294_v35 = vld [vmem:[#allocation2 + $0xb8] sm:$0xff] }
  0x72   : > { %v1977_v31 = vpack.c.bf16 %v285_v29, %v281_v28  ;;  %1214 = vmatprep.subr.bf16.mxu1 %v1974_v27  ;;  %v289_v36 = vld [vmem:[#allocation2 + $0x90] sm:$0xff]  ;;  %v1984_v37 = vpack.c.bf16 %v300_v32, %v296_v30  ;;  %v295_v38 = vld [vmem:[#allocation2 + $0xc0] sm:$0xff]  ;;  %v1986_v40 = vpack.c.bf16 %v294_v35, %v290_v34  ;;  %v304_v42 = vld [vmem:[#allocation2 + $0x108] sm:$0xff] }
  0x73   : > { %1184 = vmatpush1.bf16.msra.mxu0 %v1964_v17  ;;  %v299_v39 = vld [vmem:[#allocation2 + $0xe0] sm:$0xff]  ;;  %v293_v41 = vld [vmem:[#allocation2 + $0xb0] sm:$0xff]  ;;  %v308_v43 = vld [vmem:[#allocation2 + $0x128] sm:$0xff] }
  0x74   : > { %1186 = vmatprep.subr.bf16.mxu0 %v1971_v23  ;;  %v298_v44 = vld [vmem:[#allocation2 + $0xd8] sm:$0xff]  ;;  %1216 = vmatpush1.bf16.msra.mxu1 %v1977_v31  ;;  %v1989_v45 = vpack.c.bf16 %v293_v41, %v289_v36  ;;  %v1992_v47 = vpack.c.bf16 %v299_v39, %v295_v38  ;;  %v303_v48 = vld [vmem:[#allocation2 + $0x100] sm:$0xff]  ;;  %v297_v50 = vld [vmem:[#allocation2 + $0xd0] sm:$0xff]  ;;  %v1998_v52 = vpack.c.bf16 %v308_v43, %v304_v42 }
  0x75   : > { %v302_v46 = vld [vmem:[#allocation2 + $0xf8] sm:$0xff]  ;;  %1218 = vmatprep.subr.bf16.mxu1 %v1986_v40  ;;  %v301_v51 = vld [vmem:[#allocation2 + $0xf0] sm:$0xff]  ;;  %v307_v53 = vld [vmem:[#allocation2 + $0x120] sm:$0xff] }
  0x76   : > { %v1995_v49 = vpack.c.bf16 %v302_v46, %v298_v44  ;;  %v306_v54 = vld [vmem:[#allocation2 + $0x118] sm:$0xff]  ;;  %v312_v56 = vld [vmem:[#allocation2 + $0x148] sm:$0xff]  ;;  %v2001_v58 = vpack.c.bf16 %v301_v51, %v297_v50  ;;  %v2004_v59 = vpack.c.bf16 %v307_v53, %v303_v48  ;;  %v311_v60 = vld [vmem:[#allocation2 + $0x140] sm:$0xff]  ;;  %v247_v51 = vlaneseq }
  0x77   : > { %1188 = vmatpush1.bf16.msra.mxu0 %v1980_v33  ;;  %v310_v55 = vld [vmem:[#allocation2 + $0x138] sm:$0xff]  ;;  %v316_v57 = vld [vmem:[#allocation2 + $0x168] sm:$0xff]  ;;  %v305_v62 = vld [vmem:[#allocation2 + $0x110] sm:$0xff] }
  0x78   : > { %1190 = vmatprep.subr.bf16.mxu0 %v1984_v37  ;;  %1220 = vmatpush1.bf16.msra.mxu1 %v1989_v45  ;;  %v2007_v61 = vpack.c.bf16 %v310_v55, %v306_v54  ;;  %v309_v63 = vld [vmem:[#allocation2 + $0x130] sm:$0xff]  ;;  %v2010_v0 = vpack.c.bf16 %v316_v57, %v312_v56  ;;  %v315_v1 = vld [vmem:[#allocation2 + $0x160] sm:$0xff]  ;;  %v314_v2 = vld [vmem:[#allocation2 + $0x158] sm:$0xff]  ;;  %v248_v53 = vshrl.u32 %v247_v51, 7 }
  0x79   : > { %1222 = vmatprep.subr.bf16.mxu1 %v1995_v49  ;;  %v318_v3 = vld [vmem:[#allocation2 + $0x178] sm:$0xff]  ;;  %v320_v5 = vld [vmem:[#allocation2 + $0x188] sm:$0xff]  ;;  %v2013_v7 = vpack.c.bf16 %v309_v63, %v305_v62  ;;  %v2016_v11 = vpack.c.bf16 %v315_v1, %v311_v60  ;;  %v319_v12 = vld [vmem:[#allocation2 + $0x180] sm:$0xff] }
  0x7a   : > { %v324_v6 = vld [vmem:[#allocation2 + $0x1a8] sm:$0xff]  ;;  %v2019_v13 = vpack.c.bf16 %v318_v3, %v314_v2  ;;  %v313_v14 = vld [vmem:[#allocation2 + $0x150] sm:$0xff]  ;;  %v323_v20 = vld [vmem:[#allocation2 + $0x1a0] sm:$0xff]  ;;  %v249_v54 = vsub.s32 0, %v248_v53  ;;  %v253_v56 = vsub.s32 1, %v248_v53  ;;  %v257_v57 = vsub.s32 2, %v248_v53 }
  0x7b   : > { %1192 = vmatpush1.bf16.msra.mxu0 %v1992_v47  ;;  %v317_v15 = vld [vmem:[#allocation2 + $0x170] sm:$0xff]  ;;  %v2022_v16 = vpack.c.bf16 %v324_v6, %v320_v5  ;;  %v322_v21 = vld [vmem:[#allocation2 + $0x198] sm:$0xff]  ;;  %v328_v24 = vld [vmem:[#allocation2 + $0x1c8] sm:$0xff]  ;;  %v2028_v28 = vpack.c.bf16 %v323_v20, %v319_v12  ;;  %v261_v6 = vsub.s32 3, %v248_v53 }
  0x7c   : > { %1194 = vmatprep.subr.bf16.mxu0 %v1998_v52  ;;  %1224 = vmatpush1.bf16.msra.mxu1 %v2001_v58  ;;  %v326_v22 = vld [vmem:[#allocation2 + $0x1b8] sm:$0xff]  ;;  %v332_v25 = vld [vmem:[#allocation2 + $0x1e8] sm:$0xff]  ;;  %v2025_v26 = vpack.c.bf16 %v317_v15, %v313_v14  ;;  %v327_v29 = vld [vmem:[#allocation2 + $0x1c0] sm:$0xff] }
  0x7d   : > { %1226 = vmatprep.subr.bf16.mxu1 %v2007_v61  ;;  %v2031_v30 = vpack.c.bf16 %v326_v22, %v322_v21  ;;  %v321_v32 = vld [vmem:[#allocation2 + $0x190] sm:$0xff]  ;;  %v2034_v35 = vpack.c.bf16 %v332_v25, %v328_v24  ;;  %v331_v36 = vld [vmem:[#allocation2 + $0x1e0] sm:$0xff]  ;;  %v330_v38 = vld [vmem:[#allocation2 + $0x1d8] sm:$0xff] }
  0x7e   : > { %v325_v34 = vld [vmem:[#allocation2 + $0x1b0] sm:$0xff]  ;;  %v334_v39 = vld [vmem:[#allocation2 + $0x1f8] sm:$0xff]  ;;  %v2040_v42 = vpack.c.bf16 %v331_v36, %v327_v29  ;;  %v240_v50 = vld [vmem:[#allocation3] sm:$0xff] }
  0x7f   : > { %1196 = vmatpush1.bf16.msra.mxu0 %v2004_v59  ;;  %v2037_v41 = vpack.c.bf16 %v325_v34, %v321_v32  ;;  %v2043_v43 = vpack.c.bf16 %v334_v39, %v330_v38  ;;  %v329_v44 = vld [vmem:[#allocation2 + $0x1d0] sm:$0xff]  ;;  %v243_v1 = vld [vmem:[%s1931_s28 + $0x8] sm:$0xff]  ;;  %v244_v5 = vld [vmem:[%s1931_s28 + $0x10] sm:$0xff] }
  0x80   : > { %1198 = vmatprep.subr.bf16.mxu0 %v2010_v0  ;;  %1228 = vmatpush1.bf16.msra.mxu1 %v2013_v7  ;;  %v333_v46 = vld [vmem:[#allocation2 + $0x1f0] sm:$0xff]  ;;  %v245_v25 = vld [vmem:[%s1931_s28 + $0x18] sm:$0xff] }
  0x81   : > { %1230 = vmatprep.subr.bf16.mxu1 %v2019_v13  ;;  %v2047_v48 = vpack.c.bf16 %v333_v46, %v329_v44  ;;  %v239_v55 = vld [vmem:[#allocation9] sm:$0xf] }
  0x82   : > { %v2088_v60 = vrot.slane %v239_v55, %v249_v54  ;;  %v242_v62 = vld [vmem:[%s1931_s28] sm:$0xff]  ;;  %v2091_v63 = vrot.slane %v239_v55, %v253_v56  ;;  %v2094_v2 = vrot.slane %v239_v55, %v257_v57  ;;  %v2100_v22 = vrot.slane %v239_v55, %v261_v6  ;;  %v241_v57 = vld [vmem:[#allocation4] sm:$0xff] }
  0x83   : > { %1200 = vmatpush1.bf16.msra.mxu0 %v2016_v11 }
  0x84   : > { %1202 = vmatprep.subr.bf16.mxu0 %v2022_v16  ;;  %1232 = vmatpush1.bf16.msra.mxu1 %v2025_v26  ;;  %v267_v3 = vadd.f32 %v2088_v60, %v242_v62  ;;  %v268_v12 = vadd.f32 %v2091_v63, %v243_v1  ;;  %v269_v15 = vadd.f32 %v2094_v2, %v244_v5 }
  0x85   : > { %1234 = vmatprep.subr.bf16.mxu1 %v2031_v30  ;;  %v270_v39 = vadd.f32 %v2100_v22, %v245_v25 }
  0x87   : > { %1204 = vmatpush1.bf16.msra.mxu0 %v2028_v28 }
  0x88   : > { %1206 = vmatprep.subr.bf16.mxu0 %v2034_v35  ;;  %1236 = vmatpush1.bf16.msra.mxu1 %v2037_v41 }
  0x89   : > { %1238 = vmatprep.subr.bf16.mxu1 %v2043_v43 }
  0x8b   : > { %1208 = vmatpush1.bf16.msra.mxu0 %v2040_v42 }
  0x8c   : > { %1242 = vmatprep.subr.bf16.mxu0 %v1954_v4  ;;  %1240 = vmatpush1.bf16.msra.mxu1 %v2047_v48 }
  0x8d   : > { %1274 = vmatprep.subr.bf16.mxu1 %v1966_v18 }
  0x8e   : > { %400 = vmatmul.mubr.f32.vlgmr.msra.gmra.mrb[0].mxu0 %v240_v50 }
  0x8f   : > { %1244 = vmatpush1.bf16.msra.mxu0 %v1958_v9  ;;  %572 = vmatprep.mubr.f32.mxu0 %v1762_v8 }
  0x90   : > { %1246 = vmatprep.subr.bf16.mxu0 %v1960_v10  ;;  %471 = vmatmul.mubr.f32.vlgmr.msra.gmra.mrb[0].mxu1 %v240_v50 }
  0x91   : > { %1276 = vmatpush1.bf16.msra.mxu1 %v1968_v19  ;;  %643 = vmatprep.mubr.f32.mxu1 %v1762_v8 }
  0x92   : > { %1278 = vmatprep.subr.bf16.mxu1 %v1974_v27 }
  0x93   : > { %1248 = vmatpush1.bf16.msra.mxu0 %v1964_v17 }
  0x94   : > { %1250 = vmatprep.subr.bf16.mxu0 %v1971_v23 }
  0x95   : > { %1280 = vmatpush1.bf16.msra.mxu1 %v1977_v31 }
  0x96   : > { %1282 = vmatprep.subr.bf16.mxu1 %v1986_v40 }
  0x97   : > { %1252 = vmatpush1.bf16.msra.mxu0 %v1980_v33 }
  0x98   : > { %1254 = vmatprep.subr.bf16.mxu0 %v1984_v37 }
  0x99   : > { %1284 = vmatpush1.bf16.msra.mxu1 %v1989_v45 }
  0x9a   : > { %1286 = vmatprep.subr.bf16.mxu1 %v1995_v49 }
  0x9b   : > { %1256 = vmatpush1.bf16.msra.mxu0 %v1992_v47 }
  0x9c   : > { %1258 = vmatprep.subr.bf16.mxu0 %v1998_v52 }
  0x9d   : > { %1288 = vmatpush1.bf16.msra.mxu1 %v2001_v58 }
  0x9e   : > { %1290 = vmatprep.subr.bf16.mxu1 %v2007_v61 }
  0x9f   : > { %1260 = vmatpush1.bf16.msra.mxu0 %v2004_v59 }
  0xa0   : > { %1262 = vmatprep.subr.bf16.mxu0 %v2010_v0 }
  0xa1   : > { %1292 = vmatpush1.bf16.msra.mxu1 %v2013_v7 }
  0xa2   : > { %1294 = vmatprep.subr.bf16.mxu1 %v2019_v13 }
  0xa3   : > { %1264 = vmatpush1.bf16.msra.mxu0 %v2016_v11 }
  0xa4   : > { %1266 = vmatprep.subr.bf16.mxu0 %v2022_v16 }
  0xa5   : > { %1296 = vmatpush1.bf16.msra.mxu1 %v2025_v26 }
  0xa6   : > { %1298 = vmatprep.subr.bf16.mxu1 %v2031_v30 }
  0xa7   : > { %1268 = vmatpush1.bf16.msra.mxu0 %v2028_v28 }
  0xa8   : > { %1270 = vmatprep.subr.bf16.mxu0 %v2034_v35 }
  0xa9   : > { %1300 = vmatpush1.bf16.msra.mxu1 %v2037_v41 }
  0xaa   : > { %1302 = vmatprep.subr.bf16.mxu1 %v2043_v43 }
  0xab   : > { %1272 = vmatpush1.bf16.msra.mxu0 %v2040_v42 }
  0xac   : > { %1306 = vmatprep.subr.bf16.mxu0 %v1954_v4 }
  0xad   : > { %1304 = vmatpush1.bf16.msra.mxu1 %v2047_v48 }
  0xae   : > { %1338 = vmatprep.subr.bf16.mxu1 %v1966_v18 }
 0x161   : > { %v401_v14 = vpop.f32.mrb[0].mxu0 }
 0x162   : > { %v477_v20 = vadd.f32 %v401_v14, %v267_v3  ;;  %v403_v21 = vpop.f32.mrb[1].mxu0 }
 0x163   : > { %v478_v24 = vadd.f32 %v403_v21, %v268_v12  ;;  %v472_v32 = vpop.f32.mrb[0].mxu1  ;;  %v1155_v21 = vld [vmem:[%s1931_s28 + $0x20] sm:$0xff] }
 0x164   : > { %v481_v29 = vmul.f32 0.5, %v477_v20  ;;  %v479_v36 = vadd.f32 %v472_v32, %v269_v15  ;;  %v474_v38 = vpop.f32.mrb[1].mxu1  ;;  %v504_v25 = vadd.f32 %v1155_v21, %v2088_v60 }
 0x165   : > { %v485_v34 = vmul.f32 0.5, %v478_v24  ;;  %v480_v44 = vadd.f32 %v474_v38, %v270_v39  ;;  %v1156_v24 = vld [vmem:[%s1931_s28 + $0x28] sm:$0xff] }
 0x166   : > { %1518 = vtanh.f32 %v481_v29  ;;  %v1157_v29 = vld [vmem:[%s1931_s28 + $0x30] sm:$0xff]  ;;  %v505_v32 = vadd.f32 %v1156_v24, %v2091_v63 }
 0x167   : > { %1520 = vtanh.f32 %v485_v34  ;;  %v490_v46 = vmul.f32 0.5, %v480_v44  ;;  %v506_v39 = vadd.f32 %v1157_v29, %v2094_v2 }
 0x168   : > { %1522 = vtanh.f32 %v479_v36 }
 0x169   : > { %1524 = vtanh.f32 %v490_v46 }
 0x170   : > { %v1519_v50 = vpop.eup %1518 }
 0x171   : > { %v1521_v51 = vpop.eup %1520  ;;  %v483_v53 = vmul.f32 0.5, %v1519_v50 }
 0x172   : > { %v1523_v54 = vpop.eup %1522  ;;  %v487_v55 = vmul.f32 0.5, %v1521_v51  ;;  %v1158_v51 = vld [vmem:[%s1931_s28 + $0x38] sm:$0xff] }
 0x173   : > { %v484_v56 = vadd.f32 0.5, %v483_v53  ;;  %v1525_v6 = vpop.eup %1524 }
 0x174   : > { %v488_v62 = vadd.f32 0.5, %v487_v55  ;;  %v492_v12 = vmul.f32 0.5, %v1525_v6 }
 0x175   : > { %v495_v1 = vmul.f32 %v1523_v54, %v484_v56  ;;  %v507_v54 = vadd.f32 %v1158_v51, %v2100_v22 }
 0x176   : > { %v494_v3 = vmul.f32 %v488_v62, %v241_v57  ;;  %v493_v14 = vadd.f32 0.5, %v492_v12 }
 0x178   : > { %v2104_v5 = vadd.f32 %v495_v1, %v494_v3 }
 0x17a   : > { %1526 = vtanh.f32 %v2104_v5 }
 0x184   : > { %v1527_v15 = vpop.eup %1526 }
 0x185   : > { %v498_v20 = vmul.f32 %v1527_v15, %v493_v14 }
 0x187   : > { %573 = vmatmul.mubr.f32.vlgmr.msra.gmra.mrb[2].mxu0 %v498_v20  ;;  %644 = vmatmul.mubr.f32.vlgmr.msra.gmra.mrb[2].mxu1 %v498_v20 }
 0x188   : > { %1308 = vmatpush1.bf16.msra.mxu0 %v1958_v9  ;;  %1340 = vmatpush1.bf16.msra.mxu1 %v1968_v19 }
 0x189   : > { %1310 = vmatprep.subr.bf16.mxu0 %v1960_v10  ;;  %1342 = vmatprep.subr.bf16.mxu1 %v1974_v27 }
 0x18a   : > { %745 = vmatprep.mubr.f32.mxu0 %v1762_v8  ;;  %816 = vmatprep.mubr.f32.mxu1 %v1762_v8 }
 0x18c   : > { %1312 = vmatpush1.bf16.msra.mxu0 %v1964_v17  ;;  %1344 = vmatpush1.bf16.msra.mxu1 %v1977_v31 }
 0x18d   : > { %1314 = vmatprep.subr.bf16.mxu0 %v1971_v23  ;;  %1346 = vmatprep.subr.bf16.mxu1 %v1986_v40 }
 0x190   : > { %1316 = vmatpush1.bf16.msra.mxu0 %v1980_v33  ;;  %1348 = vmatpush1.bf16.msra.mxu1 %v1989_v45 }
 0x191   : > { %1318 = vmatprep.subr.bf16.mxu0 %v1984_v37  ;;  %1350 = vmatprep.subr.bf16.mxu1 %v1995_v49 }
 0x194   : > { %1320 = vmatpush1.bf16.msra.mxu0 %v1992_v47  ;;  %1352 = vmatpush1.bf16.msra.mxu1 %v2001_v58 }
 0x195   : > { %1322 = vmatprep.subr.bf16.mxu0 %v1998_v52  ;;  %1354 = vmatprep.subr.bf16.mxu1 %v2007_v61 }
 0x198   : > { %1324 = vmatpush1.bf16.msra.mxu0 %v2004_v59  ;;  %1356 = vmatpush1.bf16.msra.mxu1 %v2013_v7 }
 0x199   : > { %1326 = vmatprep.subr.bf16.mxu0 %v2010_v0  ;;  %1358 = vmatprep.subr.bf16.mxu1 %v2019_v13 }
 0x19c   : > { %1328 = vmatpush1.bf16.msra.mxu0 %v2016_v11  ;;  %1360 = vmatpush1.bf16.msra.mxu1 %v2025_v26 }
 0x19d   : > { %1330 = vmatprep.subr.bf16.mxu0 %v2022_v16  ;;  %1362 = vmatprep.subr.bf16.mxu1 %v2031_v30 }
 0x1a0   : > { %1332 = vmatpush1.bf16.msra.mxu0 %v2028_v28  ;;  %1364 = vmatpush1.bf16.msra.mxu1 %v2037_v41 }
 0x1a1   : > { %1334 = vmatprep.subr.bf16.mxu0 %v2034_v35  ;;  %1366 = vmatprep.subr.bf16.mxu1 %v2043_v43 }
 0x1a4   : > { %1336 = vmatpush1.bf16.msra.mxu0 %v2040_v42  ;;  %1368 = vmatpush1.bf16.msra.mxu1 %v2047_v48 }
 0x1a5   : > { %1370 = vmatprep.subr.bf16.mxu0 %v1954_v4  ;;  %1402 = vmatprep.subr.bf16.mxu1 %v1966_v18 }
 0x25a   : > { %v574_v34 = vpop.f32.mrb[2].mxu0  ;;  %v645_v36 = vpop.f32.mrb[2].mxu1 }
 0x25b   : > { %v650_v38 = vadd.f32 %v574_v34, %v504_v25  ;;  %v576_v44 = vpop.f32.mrb[3].mxu0  ;;  %v647_v46 = vpop.f32.mrb[3].mxu1  ;;  %v652_v18 = vadd.f32 %v645_v36, %v506_v39  ;;  %v1163_v39 = vld [vmem:[%s1931_s28 + $0x60] sm:$0xff] }
 0x25c   : > { %v651_v50 = vadd.f32 %v576_v44, %v505_v32  ;;  %v653_v55 = vadd.f32 %v647_v46, %v507_v54  ;;  %v1164_v44 = vld [vmem:[%s1931_s28 + $0x68] sm:$0xff]  ;;  %v850_v46 = vadd.f32 %v1163_v39, %v2088_v60 }
 0x25d   : > { %v654_v53 = vmul.f32 0.5, %v650_v38  ;;  %v851_v51 = vadd.f32 %v1164_v44, %v2091_v63 }
 0x25e   : > { %v658_v4 = vmul.f32 0.5, %v651_v50  ;;  %v663_v56 = vmul.f32 0.5, %v653_v55  ;;  %v1165_v50 = vld [vmem:[%s1931_s28 + $0x70] sm:$0xff] }
 0x25f   : > { %1528 = vtanh.f32 %v654_v53  ;;  %v852_v54 = vadd.f32 %v1165_v50, %v2094_v2 }
 0x260   : > { %1530 = vtanh.f32 %v658_v4 }
 0x261   : > { %1532 = vtanh.f32 %v652_v18 }
 0x262   : > { %1534 = vtanh.f32 %v663_v56 }
 0x269   : > { %v1529_v57 = vpop.eup %1528 }
 0x26a   : > { %v1531_v62 = vpop.eup %1530  ;;  %v656_v1 = vmul.f32 0.5, %v1529_v57 }
 0x26b   : > { %v660_v3 = vmul.f32 0.5, %v1531_v62  ;;  %v1533_v12 = vpop.eup %1532  ;;  %v1166_v62 = vld [vmem:[%s1931_s28 + $0x78] sm:$0xff] }
 0x26c   : > { %v657_v6 = vadd.f32 0.5, %v656_v1  ;;  %v1535_v24 = vpop.eup %1534 }
 0x26d   : > { %v661_v14 = vadd.f32 0.5, %v660_v3  ;;  %v665_v25 = vmul.f32 0.5, %v1535_v24 }
 0x26e   : > { %v668_v15 = vmul.f32 %v1533_v12, %v657_v6  ;;  %v853_v12 = vadd.f32 %v1166_v62, %v2100_v22 }
 0x26f   : > { %v667_v20 = vmul.f32 %v661_v14, %v2104_v5  ;;  %v666_v29 = vadd.f32 0.5, %v665_v25 }
 0x271   : > { %v2150_v21 = vadd.f32 %v668_v15, %v667_v20 }
 0x273   : > { %1536 = vtanh.f32 %v2150_v21 }
 0x27d   : > { %v1537_v32 = vpop.eup %1536 }
 0x27e   : > { %v671_v34 = vmul.f32 %v1537_v32, %v666_v29 }
 0x280   : > { %746 = vmatmul.mubr.f32.vlgmr.msra.gmra.mrb[4].mxu0 %v671_v34  ;;  %817 = vmatmul.mubr.f32.vlgmr.msra.gmra.mrb[4].mxu1 %v671_v34 }
 0x281   : > { %1372 = vmatpush1.bf16.msra.mxu0 %v1958_v9  ;;  %1404 = vmatpush1.bf16.msra.mxu1 %v1968_v19  ;;  %v1160_v9 = vld [vmem:[%s1931_s28 + $0x48] sm:$0xff] }
 0x282   : > { %1374 = vmatprep.subr.bf16.mxu0 %v1960_v10  ;;  %1406 = vmatprep.subr.bf16.mxu1 %v1974_v27  ;;  %v678_v19 = vadd.f32 %v1160_v9, %v2091_v63 }
 0x283   : > { %918 = vmatprep.mubr.f32.mxu0 %v1762_v8  ;;  %989 = vmatprep.mubr.f32.mxu1 %v1762_v8  ;;  %v1159_v8 = vld [vmem:[%s1931_s28 + $0x40] sm:$0xff] }
 0x284   : > { %v677_v10 = vadd.f32 %v1159_v8, %v2088_v60 }
 0x285   : > { %1376 = vmatpush1.bf16.msra.mxu0 %v1964_v17  ;;  %1408 = vmatpush1.bf16.msra.mxu1 %v1977_v31  ;;  %v1161_v17 = vld [vmem:[%s1931_s28 + $0x50] sm:$0xff] }
 0x286   : > { %1378 = vmatprep.subr.bf16.mxu0 %v1971_v23  ;;  %1410 = vmatprep.subr.bf16.mxu1 %v1986_v40 }
 0x289   : > { %1380 = vmatpush1.bf16.msra.mxu0 %v1980_v33  ;;  %1412 = vmatpush1.bf16.msra.mxu1 %v1989_v45  ;;  %v679_v33 = vadd.f32 %v1161_v17, %v2094_v2 }
 0x28a   : > { %1382 = vmatprep.subr.bf16.mxu0 %v1984_v37  ;;  %1414 = vmatprep.subr.bf16.mxu1 %v1995_v49 }
 0x28d   : > { %1384 = vmatpush1.bf16.msra.mxu0 %v1992_v47  ;;  %1416 = vmatpush1.bf16.msra.mxu1 %v2001_v58  ;;  %v1162_v47 = vld [vmem:[%s1931_s28 + $0x58] sm:$0xff] }
 0x28e   : > { %1386 = vmatprep.subr.bf16.mxu0 %v1998_v52  ;;  %1418 = vmatprep.subr.bf16.mxu1 %v2007_v61 }
 0x291   : > { %1388 = vmatpush1.bf16.msra.mxu0 %v2004_v59  ;;  %1420 = vmatpush1.bf16.msra.mxu1 %v2013_v7  ;;  %v680_v59 = vadd.f32 %v1162_v47, %v2100_v22 }
 0x292   : > { %1390 = vmatprep.subr.bf16.mxu0 %v2010_v0  ;;  %1422 = vmatprep.subr.bf16.mxu1 %v2019_v13 }
 0x295   : > { %1392 = vmatpush1.bf16.msra.mxu0 %v2016_v11  ;;  %1424 = vmatpush1.bf16.msra.mxu1 %v2025_v26 }
 0x296   : > { %1394 = vmatprep.subr.bf16.mxu0 %v2022_v16  ;;  %1426 = vmatprep.subr.bf16.mxu1 %v2031_v30 }
 0x299   : > { %1396 = vmatpush1.bf16.msra.mxu0 %v2028_v28  ;;  %1428 = vmatpush1.bf16.msra.mxu1 %v2037_v41 }
 0x29a   : > { %1398 = vmatprep.subr.bf16.mxu0 %v2034_v35  ;;  %1430 = vmatprep.subr.bf16.mxu1 %v2043_v43 }
 0x29d   : > { %1400 = vmatpush1.bf16.msra.mxu0 %v2040_v42  ;;  %1432 = vmatpush1.bf16.msra.mxu1 %v2047_v48 }
 0x353   : > { %v747_v23 = vpop.f32.mrb[4].mxu0  ;;  %v818_v27 = vpop.f32.mrb[4].mxu1 }
 0x354   : > { %v823_v31 = vadd.f32 %v747_v23, %v677_v10  ;;  %v749_v37 = vpop.f32.mrb[5].mxu0  ;;  %v820_v40 = vpop.f32.mrb[5].mxu1  ;;  %v825_v58 = vadd.f32 %v818_v27, %v679_v33 }
 0x355   : > { %v824_v45 = vadd.f32 %v749_v37, %v678_v19  ;;  %v826_v61 = vadd.f32 %v820_v40, %v680_v59 }
 0x356   : > { %v827_v49 = vmul.f32 0.5, %v823_v31 }
 0x357   : > { %v831_v52 = vmul.f32 0.5, %v824_v45  ;;  %v836_v0 = vmul.f32 0.5, %v826_v61 }
 0x358   : > { %1538 = vtanh.f32 %v827_v49 }
 0x359   : > { %1540 = vtanh.f32 %v831_v52 }
 0x35a   : > { %1542 = vtanh.f32 %v825_v58 }
 0x35b   : > { %1544 = vtanh.f32 %v836_v0 }
 0x362   : > { %v1539_v7 = vpop.eup %1538 }
 0x363   : > { %v1541_v11 = vpop.eup %1540  ;;  %v829_v13 = vmul.f32 0.5, %v1539_v7 }
 0x364   : > { %v833_v16 = vmul.f32 0.5, %v1541_v11  ;;  %v1543_v28 = vpop.eup %1542 }
 0x365   : > { %v830_v26 = vadd.f32 0.5, %v829_v13  ;;  %v1545_v43 = vpop.eup %1544 }
 0x366   : > { %v834_v30 = vadd.f32 0.5, %v833_v16  ;;  %v838_v48 = vmul.f32 0.5, %v1545_v43 }
 0x367   : > { %v841_v35 = vmul.f32 %v1543_v28, %v830_v26 }
 0x368   : > { %v840_v41 = vmul.f32 %v834_v30, %v2150_v21  ;;  %v839_v5 = vadd.f32 0.5, %v838_v48 }
 0x36a   : > { %v842_v42 = vadd.f32 %v841_v35, %v840_v41 }
 0x36c   : > { %1546 = vtanh.f32 %v842_v42 }
 0x376   : > { %v1547_v36 = vpop.eup %1546 }
 0x377   : > { %v844_v38 = vmul.f32 %v1547_v36, %v839_v5 }
 0x379   : > { %919 = vmatmul.mubr.f32.vlgmr.msra.gmra.mrb[6].mxu0 %v844_v38  ;;  %990 = vmatmul.mubr.f32.vlgmr.msra.gmra.mrb[6].mxu1 %v844_v38 }
 0x44c   : > { %v920_v53 = vpop.f32.mrb[6].mxu0  ;;  %v991_v4 = vpop.f32.mrb[6].mxu1 }
 0x44d   : > { %v996_v18 = vadd.f32 %v920_v53, %v850_v46  ;;  %v922_v55 = vpop.f32.mrb[7].mxu0  ;;  %v993_v56 = vpop.f32.mrb[7].mxu1  ;;  %v998_v6 = vadd.f32 %v991_v4, %v852_v54 }
 0x44e   : > { %v997_v57 = vadd.f32 %v922_v55, %v851_v51  ;;  %v999_v60 = vadd.f32 %v993_v56, %v853_v12 }
 0x44f   : > { %v1000_v1 = vmul.f32 0.5, %v996_v18 }
 0x450   : > { %v1004_v3 = vmul.f32 0.5, %v997_v57  ;;  %v1009_v14 = vmul.f32 0.5, %v999_v60 }
 0x451   : > { %1548 = vtanh.f32 %v1000_v1 }
 0x452   : > { %1550 = vtanh.f32 %v1004_v3 }
 0x453   : > { %1552 = vtanh.f32 %v998_v6 }
 0x454   : > { %1554 = vtanh.f32 %v1009_v14 }
 0x45b   : > { %v1549_v63 = vpop.eup %1548 }
 0x45c   : > { %v1551_v15 = vpop.eup %1550  ;;  %v1002_v20 = vmul.f32 0.5, %v1549_v63 }
 0x45d   : > { %v1006_v21 = vmul.f32 0.5, %v1551_v15  ;;  %v1553_v24 = vpop.eup %1552 }
 0x45e   : > { %v1003_v2 = vadd.f32 0.5, %v1002_v20  ;;  %v1555_v8 = vpop.eup %1554 }
 0x45f   : > { %v1007_v25 = vadd.f32 0.5, %v1006_v21  ;;  %v1011_v9 = vmul.f32 0.5, %v1555_v8 }
 0x460   : > { %v1014_v29 = vmul.f32 %v1553_v24, %v1003_v2 }
 0x461   : > { %v1013_v32 = vmul.f32 %v1007_v25, %v842_v42  ;;  %v1012_v22 = vadd.f32 0.5, %v1011_v9 }
 0x463   : > { %v1015_v34 = vadd.f32 %v1014_v29, %v1013_v32 }
 0x465   : > { %1556 = vtanh.f32 %v1015_v34  ;;  %1019 = vst [vmem:[#allocation4] sm:$0xff] %v1015_v34 }
 0x46c   : > { %1023 = sbr.rel (%p1167_p2) target bundleno = 1147 (0x47b), region = 48  ;;  %v1026_v23 = vld [vmem:[#allocation4] sm:$0xff] (!%p1167_p2) }
 0x46d   : > { %1027 = vst [vmem:[#allocation12] sm:$0xff] (!%p1167_p2), %v1026_v23 }
 0x46f   : > { %v1557_v10 = vpop.eup %1556 }
 0x470   : > { %v1017_v17 = vmul.f32 %v1557_v10, %v1012_v22 }
 0x472   : > { %1018 = vst [vmem:[#allocation3] sm:$0xff] %v1017_v17 }
 0x479   : > { %v1024_v19 = vld [vmem:[#allocation3] sm:$0xff] }
 0x47a   : > { %1025 = vst [vmem:[#allocation11] sm:$0xff] %v1024_v19 }
 0x47b PF: > { %p2205_p5 = scmp.eq.s32.totalorder %s1143_s21, 1  ;;  %s1763_s13 = smov [#allocation11]  }
 0x47c   : > { %s1037_s26 = sshll.u32 %s1763_s13, 4  ;;  %s1764_s5 = smov [#allocation12]   ;;  %s1038_s26 = int_to_ptr.vmem [resolvable:$true] %s1037_s26 }
 0x47d   : > { %s1050_s6 = sshll.u32 %s1764_s5, 4  ;;  %s1638_s18 = scalar_lea.vmem %s1038_s26, 128  ;;  %s2209_s6 = int_to_ptr.vmem [resolvable:$true] %s1050_s6 }
 0x47e   : > { %p1639_p11 = scmp.ne.s32.totalorder %s1038_s26, %s1638_s18  ;;  %p1645_p3 = scmp.lt.s32.totalorder %s1038_s26, %s1038_s26 }
 0x47f   : > { %p1646_p4 = scmp.lt.s32.totalorder %s1638_s18, %s1638_s18 }
 0x480   : > { %p1640_p0 = pnand %p1639_p11, %p2205_p5 }
 0x481   : > { %p1647_p7 = por %p1646_p4, %p1645_p3 }
 0x482   : > { %p1641_p8 = pneg %p1640_p0 }
 0x484   : > { %p1648_p9 = pnand %p1647_p7, %p1641_p8 }
 0x486   : > { %1651 = shalt.err (!%p1648_p9)
}
 0x487   : > { %s1652_s22 = scalar_lea.hbm %s2281_s3, 128 }
 0x488   : > { %p1653_p10 = scmp.ne.s32.totalorder %s2281_s3, %s1652_s22  ;;  %p1658_p12 = scmp.lt.u32.totalorder %s1652_s22, %s2281_s3 }
 0x48a   : > { %p1654_p13 = pnand %p1653_p10, %p2205_p5 }
 0x48c   : > { %p1655_p6 = pneg %p1654_p13 }
 0x48e   : > { %p1660_p1 = pnand %p1658_p12, %p1655_p6 }
 0x490   : > { %1663 = shalt.err (!%p1660_p1)
}
 0x491   : > { %1440 = dma.vmem_to_hbm [thread:$0]  (%p2205_p5), %s1038_s26, 128, %s2281_s3, [#allocation8]  }
 0x492   : > { %s1664_s11 = scalar_lea.vmem %s2209_s6, 128  ;;  %p1671_p8 = scmp.lt.s32.totalorder %s2209_s6, %s2209_s6 }
 0x493   : > { %p1665_p2 = scmp.ne.s32.totalorder %s2209_s6, %s1664_s11  ;;  %p1672_p3 = scmp.lt.s32.totalorder %s1664_s11, %s1664_s11 }
 0x495   : > { %p1666_p11 = pnand %p1665_p2, %p2205_p5  ;;  %p1673_p4 = por %p1672_p3, %p1671_p8 }
 0x497   : > { %p1667_p0 = pneg %p1666_p11 }
 0x499   : > { %p1674_p7 = pnand %p1673_p4, %p1667_p0 }
 0x49b   : > { %1677 = shalt.err (!%p1674_p7)
}
 0x49c   : > { %s1678_s8 = scalar_lea.hbm %s2282_s4, 128 }
 0x49d   : > { %p1679_p9 = scmp.ne.s32.totalorder %s2282_s4, %s1678_s8  ;;  %p1684_p6 = scmp.lt.u32.totalorder %s1678_s8, %s2282_s4 }
 0x49f   : > { %p1680_p10 = pnand %p1679_p9, %p2205_p5 }
 0x4a1   : > { %p1681_p13 = pneg %p1680_p10 }
 0x4a3   : > { %p1686_p12 = pnand %p1684_p6, %p1681_p13 }
 0x4a5   : > { %1689 = shalt.err (!%p1686_p12)
}
 0x4a6   : > { %1442 = dma.vmem_to_hbm [thread:$0]  (%p2205_p5), %s2209_s6, 128, %s2282_s4, [#allocation13]  }
 0x4a7   : > { %1725 = dma.done.wait (%p2205_p5), [#allocation8], 128  }
 0x4a8   : > { %1727 = vsyncadd (%p2205_p5), [#allocation8], 4294967168 }
 0x4a9   : > { %1729 = dma.done.wait (%p2205_p5), [#allocation13], 128  }
 0x4aa   : > { %1731 = vsyncadd (%p2205_p5), [#allocation13], 4294967168 }
 0x4ab PF: > { %s21_s20 = sadd.s32 1, %s1754_s20   ;;  %s2299_s6 = smov %s2306_s15 }
 0x4ac   : > { %p18_p1 = scmp.ge.s32.totalorder %s21_s20, 4   ;;  %s2300_s15 = smov %s1738_s16 }
 0x4ad   : > { %s2301_s16 = smov %s1742_s17  ;;  %s2302_s17 = smov %s1926_s14 }
 0x4ae   : > { %s2303_s18 = smov %s1750_s19  ;;  %s2304_s19 = smov %s2299_s6 }
 0x4af   :  { %20 = sbr.rel (!%p18_p1) target bundleno = 7 (0x7), region = 94 }
 0x4b6   :  { %1067 = vsyncpa [#allocation7], 1 }
 0x4b7   :  { %1069 = vsyncpa [#allocation7 + $0x1], 1 }
 0x4b8   :  { %1070 = vsyncpa [#allocation10], 1 }
 0x4b9   :  { %1071 = vsyncpa [#allocation8], 1 }
 0x4ba   :  { %1073 = vsyncpa [#allocation8 + $0x1], 1 }
 0x4bb   :  { %1074 = vsyncpa [#allocation13], 1 }
 0x4bc   :  { %1075 = vsyncmov [#allocation5] }
 0x4bf   :  { %s1076_s12 = vpop.sfrf %1075 }
 0x4c0   :  { %p1174_p5 = scmp.ne.s32.totalorder %s1076_s12, 0 }
 0x4c2   :  { %1080 = shalt.err (%p1174_p5)  }

</bundles_post_ra>
